<compile_context>
chip_gen: v5e
topology: v5e:2x2
jax: 0.10.0
libtpu: 0.0.40
codegen_flags: <defaults>
</compile_context>

<pallas_src>
import functools

import jax
import jax.numpy as jnp
from jax import lax
from jax.experimental import pallas as pl
from jax.experimental.pallas import tpu as pltpu


def _gate_kernel(img_ref, para_ref, out_ref, acc_ref, *, inv_n, n_total, mask_n):
    # img_ref : (TB, TN, C)   para_ref : (TN, C)   out_ref : (TB, C)
    # acc_ref : (TB, C) f32 scratch, resident across the N (reduction) axis.
    k = pl.program_id(1)

    @pl.when(k == 0)
    def _():
        acc_ref[...] = jnp.zeros_like(acc_ref)

    img = img_ref[...].astype(jnp.float32)
    para = para_ref[...].astype(jnp.float32)
    prod = img * para[None]                         # VPU elementwise, f32 accumulate

    if mask_n:                                      # ragged last N-block only
        tn = img.shape[1]
        n_idx = k * tn + lax.broadcasted_iota(jnp.int32, (1, tn, 1), 1)
        prod = jnp.where(n_idx < n_total, prod, 0.0)

    acc_ref[...] += jnp.sum(prod, axis=1)           # sublane reduce (XLU slot)

    @pl.when(k == pl.num_programs(1) - 1)
    def _():
        out_ref[...] = (acc_ref[...] * inv_n).astype(out_ref.dtype)


def _vmem_budget_bytes():
    """~3/4 of per-core VMEM (headroom for compiler scratch): ~96 MiB on
    v5e/v6e (128 MiB physical), ~48 MiB on v7x (64 MiB per TensorCore)."""
    cap = 64 * 1024 * 1024                          # conservative fallback
    try:
        cap = int(pltpu.get_tpu_info().vmem_capacity_bytes)
    except Exception:
        pass
    return (cap * 3) // 4


def _derive_tiles(B, N, C, budget, itemsize):
    """Pick (TB, TN) so the double-buffered pipeline fits the VMEM budget.

    Footprint model (lane-padded C, sublane-padded tiles):
      image block : 2 * TB * TN * C_pad * itemsize   (double buffered)
      param block : 2 *      TN * C_pad * itemsize   (double buffered)
      out   block : 2 * TB *      C_pad * itemsize   (double buffered)
      accumulator :     TB *      C_pad * 4          (f32 scratch)
    Sublane-axis tile sizes (TB for out, TN for image/param) must be a
    multiple of 8 or equal the full dim.
    """
    pad8 = lambda x: -(-x // 8) * 8
    c_pad = -(-C // 128) * 128
    unit = c_pad * itemsize

    def fits(tb, tn):
        tbp, tnp = pad8(tb), pad8(tn)
        return (2 * tbp * tnp * unit + 2 * tnp * unit
                + 2 * tbp * unit + tbp * c_pad * 4) <= budget

    tb_floor = B if B < 8 else 8

    # --- TN: full N if it fits with the smallest batch tile, otherwise the
    #     largest multiple of 8 that does (N becomes a grid reduction axis).
    if fits(tb_floor, N):
        TN = N
    else:
        tbp = pad8(tb_floor)
        per_tn = (2 * tbp + 2) * unit
        fixed = 2 * tbp * unit + tbp * c_pad * 4
        TN = max(8, min(N, int((budget - fixed) // per_tn) // 8 * 8))

    # --- TB: largest multiple of 8 (<= B) that fits with TN.
    if B < 8:
        TB = B
    else:
        tnp = pad8(TN)
        per_tb = (2 * tnp + 2) * unit + c_pad * 4
        fixed = 2 * tnp * unit
        TB = max(8, min(B // 8 * 8, int((budget - fixed) // per_tb) // 8 * 8))
        # Keep >= ~8 steps on the parallel (batch) axis so both v7x
        # TensorCores get work and the pipeline has iterations to overlap.
        if B // TB < 8:
            TB = max(8, min(TB, pad8(-(-B // 8))))
    return TB, TN


@jax.jit
def image2text_gate_forward(image, select_para):
    """image: (B, N, C);  select_para: (N, C, 2) f32 (PyTorch layout).

    Returns (B, 1, C), matching the PyTorch module's output.
    """
    B, N, C = image.shape
    itemsize = jnp.dtype(image.dtype).itemsize

    # Only the REAL half of select_para reaches the output; slice it once here.
    # TODO(synk): in a real model, precompute/hoist this (N, C) slice out of
    # the hot path so the imaginary plane is never re-read per step.
    para_real = select_para[..., 0]

    budget = _vmem_budget_bytes()
    TB, TN = _derive_tiles(B, N, C, budget, itemsize)
    grid = (pl.cdiv(B, TB), pl.cdiv(N, TN))

    kernel = functools.partial(
        _gate_kernel, inv_n=1.0 / N, n_total=N, mask_n=(N % TN) != 0)

    cost = pl.CostEstimate(
        flops=2 * B * N * C,
        transcendentals=0,
        bytes_accessed=int(itemsize * (B * N * C + N * C + B * C)),
    )

    out2d = pl.pallas_call(
        kernel,
        out_shape=jax.ShapeDtypeStruct((B, C), image.dtype),
        grid=grid,
        in_specs=[
            # image: blocked over batch (parallel) and sequence (reduction)
            pl.BlockSpec((TB, TN, C), lambda b, k: (b, k, 0)),
            # select_para real part: blocked over sequence only; VMEM-resident
            # across the batch axis.
            pl.BlockSpec((TN, C), lambda b, k: (k, 0)),
        ],
        # lane-dense 2-D output slab: TB sublanes x C lanes (reshape in wrapper)
        out_specs=pl.BlockSpec((TB, C), lambda b, k: (b, 0)),
        scratch_shapes=[pltpu.VMEM((TB, C), jnp.float32)],
        compiler_params=pltpu.CompilerParams(
            dimension_semantics=("parallel", "arbitrary"),
            vmem_limit_bytes=int(budget),
        ),
        cost_estimate=cost,
    )(image, para_real)

    return out2d.reshape(B, 1, C)                   # match PyTorch output shape


def reference_forward(image, select_para):
    """Pure-JAX mirror of the PyTorch module (keeps the complex multiply)."""
    para_c = jax.lax.complex(select_para[..., 0], select_para[..., 1])  # (N, C)
    prod = image.astype(jnp.complex64) * para_c                         # (B, N, C)
    real = jnp.real(prod)
    # permute -> AvgPool1d(kernel_size=N) -> permute  ==  mean over axis 1
    return jnp.mean(real, axis=1, keepdims=True)                        # (B, 1, C)


if __name__ == "__main__":
    B, N, C = 2, 8, 16   # batch, n (sequence length), d_model

    key = jax.random.PRNGKey(0)
    k_img, k_para = jax.random.split(key)
    image = jax.random.normal(k_img, (B, N, C), jnp.float32)
    select_para = jax.random.normal(k_para, (N, C, 2), jnp.float32)

    out = image2text_gate_forward(image, select_para)
    jax.block_until_ready(out)

    ref = reference_forward(image, select_para)
    assert out.shape == (B, 1, C)
    assert jnp.allclose(out, ref, atol=1e-5, rtol=1e-5), "mismatch vs reference"

    print("KERNEL_OK")
</pallas_src>

<mosaic_0001>
module attributes {stable_mosaic.version = 11 : i64} {
  func.func @_gate_kernel(%arg0: i32, %arg1: i32, %arg2: memref<2x8x16xf32, #tpu.memory_space<vmem>>, %arg3: memref<8x16xf32, #tpu.memory_space<vmem>>, %arg4: memref<2x16xf32, #tpu.memory_space<vmem>>, %arg5: memref<2x16xf32, #tpu.memory_space<vmem>>) attributes {dimension_semantics = [#tpu.dimension_semantics<parallel>, #tpu.dimension_semantics<arbitrary>], iteration_bounds = array<i64: 1, 1>, scalar_prefetch = 0 : i64, scratch_operands = 1 : i64, tpu.core_type = #tpu.core_type<tc>, window_params = [{transform_indices = @transform_0, window_bounds = array<i64: 2, 8, 16>}, {transform_indices = @transform_1, window_bounds = array<i64: 8, 16>}, {transform_indices = @transform_2, window_bounds = array<i64: 2, 16>}]} {
    %c0_i32 = arith.constant 0 : i32
    %0 = arith.cmpi eq, %arg1, %c0_i32 : i32
    %1 = arith.extui %0 : i1 to i32
    %c0_i32_0 = arith.constant 0 : i32
    %2 = arith.cmpi ne, %1, %c0_i32_0 : i32
    scf.if %2 {
      %cst_11 = arith.constant 0.000000e+00 : f32
      %15 = vector.broadcast %cst_11 : f32 to vector<2x16xf32>
      %c0_12 = arith.constant 0 : index
      %c0_13 = arith.constant 0 : index
      %16 = vector.load %arg5[%c0_12, %c0_13] : memref<2x16xf32, #tpu.memory_space<vmem>>, vector<2x16xf32>
      tpu.vector_store %arg5[%c0_12, %c0_13], %15 {strides = array<i32>} : memref<2x16xf32, #tpu.memory_space<vmem>>, vector<2x16xf32>,
    } else {
    }
    %c0 = arith.constant 0 : index
    %c0_1 = arith.constant 0 : index
    %c0_2 = arith.constant 0 : index
    %3 = vector.load %arg2[%c0, %c0_1, %c0_2] : memref<2x8x16xf32, #tpu.memory_space<vmem>>, vector<2x8x16xf32>
    %c0_3 = arith.constant 0 : index
    %c0_4 = arith.constant 0 : index
    %4 = vector.load %arg3[%c0_3, %c0_4] : memref<8x16xf32, #tpu.memory_space<vmem>>, vector<8x16xf32>
    %5 = vector.shape_cast %4 : vector<8x16xf32> to vector<1x8x16xf32>
    %6 = vector.broadcast %5 : vector<1x8x16xf32> to vector<2x8x16xf32>
    %7 = arith.mulf %3, %6 : vector<2x8x16xf32>
    %c0_5 = arith.constant 0 : index
    %c0_6 = arith.constant 0 : index
    %8 = vector.load %arg5[%c0_5, %c0_6] : memref<2x16xf32, #tpu.memory_space<vmem>>, vector<2x16xf32>
    %cst = arith.constant dense<0.000000e+00> : vector<2x16xf32>
    %9 = vector.multi_reduction <add>, %7, %cst [1] : vector<2x8x16xf32> to vector<2x16xf32>
    %10 = arith.addf %8, %9 : vector<2x16xf32>
    %c0_7 = arith.constant 0 : index
    %c0_8 = arith.constant 0 : index
    %11 = vector.load %arg5[%c0_7, %c0_8] : memref<2x16xf32, #tpu.memory_space<vmem>>, vector<2x16xf32>
    tpu.vector_store %arg5[%c0_7, %c0_8], %10 {strides = array<i32>} : memref<2x16xf32, #tpu.memory_space<vmem>>, vector<2x16xf32>,
    %c0_i32_9 = arith.constant 0 : i32
    %12 = arith.cmpi eq, %arg1, %c0_i32_9 : i32
    %13 = arith.extui %12 : i1 to i32
    %c0_i32_10 = arith.constant 0 : i32
    %14 = arith.cmpi ne, %13, %c0_i32_10 : i32
    scf.if %14 {
      %c0_11 = arith.constant 0 : index
      %c0_12 = arith.constant 0 : index
      %15 = vector.load %arg5[%c0_11, %c0_12] : memref<2x16xf32, #tpu.memory_space<vmem>>, vector<2x16xf32>
      %cst_13 = arith.constant 1.250000e-01 : f32
      %16 = vector.broadcast %cst_13 : f32 to vector<2x16xf32>
      %17 = arith.mulf %15, %16 : vector<2x16xf32>
      %c0_14 = arith.constant 0 : index
      %c0_15 = arith.constant 0 : index
      %18 = vector.load %arg4[%c0_14, %c0_15] : memref<2x16xf32, #tpu.memory_space<vmem>>, vector<2x16xf32>
      tpu.vector_store %arg4[%c0_14, %c0_15], %17 {strides = array<i32>} : memref<2x16xf32, #tpu.memory_space<vmem>>, vector<2x16xf32>,
    } else {
    }
    return
  }
  func.func @transform_0(%arg0: i32, %arg1: i32) -> (i32, i32, i32) {
    %c0_i32 = arith.constant 0 : i32
    %c0_i32_0 = arith.constant 0 : i32
    return %arg0, %arg1, %c0_i32 : i32, i32, i32
  }
  func.func @transform_1(%arg0: i32, %arg1: i32) -> (i32, i32) {
    %c0_i32 = arith.constant 0 : i32
    %c0_i32_0 = arith.constant 0 : i32
    return %arg1, %c0_i32 : i32, i32
  }
  func.func @transform_2(%arg0: i32, %arg1: i32) -> (i32, i32) {
    %c0_i32 = arith.constant 0 : i32
    %c0_i32_0 = arith.constant 0 : i32
    return %arg0, %c0_i32 : i32, i32
  }
}

</mosaic_0001>

<bundles_post_ra>
// kernel: image2text_gate_forward.1
= control target key start
LH: loop header
LB: loop body
LE: loop exit
PB: predicated region body
PF: predicated region fallthrough
CT: control target
= control target key end

     0   :  { %7 = vsyncpa [#allocation4], 0  ;;  %s175_s0 = inlined_call_operand.hbm [shape: f32[2,8,16], index: 0, kind: input, shape index: {}]   ;;  %s176_s1 = inlined_call_operand.vmem [shape: f32[8,16], index: 1, kind: input, shape index: {}]   ;;  %s177_s2 = inlined_call_operand.hbm [shape: f32[2,16], index: 2, kind: output, shape index: {}]  }
   0x1   :  { %8 = vsyncpa [#allocation5], 0  ;;  %s13_s11 = sshll.u32 %s175_s0, 4  ;;  %s143_s12 = smov [#allocation3]   ;;  %s14_s11 = int_to_ptr.hbm [resolvable:$true] %s13_s11 }
   0x2   :  { %s15_s13 = sshll.u32 %s143_s12, 4  ;;  %s144_s14 = smov 128   ;;  %s16_s13 = int_to_ptr.vmem [resolvable:$true] %s15_s13 }
   0x3   :  { %s145_s15 = smov 8  }
   0x4   :  { %21 = dma.hbm_to_vmem [thread:$0]  %s14_s11, 256, %s16_s13, [#allocation4], %s144_s14, %s144_s14, %s145_s15  }
   0x5   :  { %139 = dma.done.wait [#allocation4], 256  }
   0x6   :  { %140 = vsyncadd [#allocation4], 4294967040  ;;  %vm32_vm0 = vcmask 123904   ;;  %v146_v0 = vmov 0.0   ;;  %v34_v1 = vld [vmem:[#allocation3] sm:$0xff]  ;;  %v35_v2 = vld [vmem:[#allocation3 + $0x8] sm:$0xff] }
   0x7   :  { %33 = vst.msk [vmem:[#allocation2] sm:$0x3] %vm32_vm0, %v146_v0  ;;  %v36_v3 = vld [vmem:[%s176_s1] sm:$0xff]  ;;  %vm40_vm1 = vcmask 130048   ;;  %vm57_vm2 = vcmask 1041409   ;;  %s147_s0 = smov [#allocation6]  }
   0x8   :  { %v37_v4 = vmul.f32 %v36_v3, %v34_v1  ;;  %v38_v5 = vmul.f32 %v36_v3, %v35_v2  ;;  %s74_s1 = sshll.u32 %s147_s0, 4  ;;  %s76_s20 = sshll.u32 %s177_s2, 4  ;;  %s75_s1 = int_to_ptr.vmem [resolvable:$true] %s74_s1  ;;  %s77_s20 = int_to_ptr.hbm [resolvable:$true] %s76_s20 }
   0xa   :  { %v41_v6 = vsel %vm40_vm1, %v37_v4, 0.0  ;;  %v48_v7 = vsel %vm40_vm1, %v38_v5, 0.0 }
   0xb   :  { %v42_v8 = vrot.slane %v41_v6, 4  ;;  %v49_v9 = vrot.slane %v48_v7, 4 }
   0xd   :  { %v43_v10 = vadd.f32 %v42_v8, %v41_v6  ;;  %v50_v11 = vadd.f32 %v49_v9, %v48_v7 }
   0xe   :  { %v39_v18 = vld [vmem:[#allocation2] sm:$0x3] }
   0xf   :  { %v44_v12 = vrot.slane %v43_v10, 2  ;;  %v51_v13 = vrot.slane %v50_v11, 2 }
  0x11   :  { %v45_v14 = vadd.f32 %v44_v12, %v43_v10  ;;  %v52_v15 = vadd.f32 %v51_v13, %v50_v11 }
  0x13   :  { %v46_v16 = vrot.slane %v45_v14, 1  ;;  %v53_v17 = vrot.slane %v52_v15, 1 }
  0x15   :  { %v47_v19 = vadd.f32 %v46_v16, %v45_v14  ;;  %v54_v20 = vadd.f32 %v53_v17, %v52_v15 }
  0x17   :  { %v58_v21 = vsel %vm57_vm2, %v54_v20, %v47_v19 }
  0x18   :  { %v60_v22 = vadd.f32 %v58_v21, %v39_v18 }
  0x1a   :  { %62 = vst.msk [vmem:[#allocation2] sm:$0x3] %vm32_vm0, %v60_v22 }
  0x21   :  { %v66_v23 = vld [vmem:[#allocation2] sm:$0x3] }
  0x22   :  { %v67_v24 = vmul.f32 0.125, %v66_v23 }
  0x24   :  { %68 = vst.msk [vmem:[#allocation6] sm:$0x3] %vm32_vm0, %v67_v24 }
  0x25   :  { %79 = dma.vmem_to_hbm [thread:$0]  %s75_s1, 32, %s77_s20, [#allocation5]  }
  0x26   :  { %141 = dma.done.wait [#allocation5], 32  }
  0x27   :  { %142 = vsyncadd [#allocation5], 4294967264 }
  0x28   :  { %84 = vsyncpa [#allocation4], 1 }
  0x29   :  { %85 = vsyncpa [#allocation5], 1 }

</bundles_post_ra>
